<compile_context>
chip_gen: v7x
topology: tpu7x:2x2x1
jax: 0.10.0
libtpu: 0.0.40
codegen_flags: <defaults>
</compile_context>

<pallas_src>
import jax
import jax.numpy as jnp
from jax.experimental import pallas as pl
from jax.experimental.pallas import tpu as pltpu


def ncf_fused_kernel(u_ref, i_ref, tblT_ref, w2_ref, out_ref):
    """One batch tile, TB samples on the lane axis.

    u_ref   : (1, TB) int32  user indices
    i_ref   : (1, TB) int32  item indices offset by num_users
    tblT_ref: (K, R)  f32    folded linear_1 (+ b1) table, transposed
    w2_ref  : (K, 1)  f32    linear_2 weight as a column
    out_ref : (1, TB) f32    logits (lane-dense)
    """
    u = u_ref[...]                                   # (1, TB)
    it = i_ref[...]                                  # (1, TB)
    R = tblT_ref.shape[1]
    TB = u.shape[1]

    # Transposed "two-hot" gather: onehot_t[r, b] = 1 iff r == u[b] or r == it[b].
    # User and offset-item index ranges are disjoint by construction.
    row = jax.lax.broadcasted_iota(jnp.int32, (R, TB), 0)
    onehot_t = jnp.logical_or(row == u, row == it).astype(jnp.float32)  # (R, TB)

    # Single MXU pass: h1^T = tblT @ onehot^T  (linear_1 and b1 already folded).
    h1t = jnp.dot(tblT_ref[...], onehot_t,
                  preferred_element_type=jnp.float32)                  # (K, TB)
    h1t = jnp.maximum(h1t, 0.0)                                        # ReLU

    # linear_2 (no bias): VPU multiply + sublane reduce over K -> lane-dense row.
    out_ref[...] = jnp.sum(h1t * w2_ref[...], axis=0, keepdims=True)   # (1, TB)


def ncf_forward(x_idx, W, H, w1, b1, w2, *, block_b=128):
    """Forward pass of NCF_DR (logits, no sigmoid -- matches module.forward).

    x_idx: (B, 2) int  -- column 0 = user index, column 1 = item index
                          (indices assumed in-range, as per nn.Embedding).
    W: (num_users, K)   H: (num_items, K)
    w1: (K, 2K) torch-style linear_1 weight,  b1: (K,)
    w2: (1, K)  torch-style linear_2 weight (no bias)
    block_b: batch tile (lane axis); keep it a multiple of 128.
    """
    B = x_idx.shape[0]
    num_users, K = W.shape
    num_items = H.shape[0]
    R = num_users + num_items

    # ---- wrapper-side one-time weight prep (folds linear_1 and b1) ----
    w1f = jnp.asarray(w1, jnp.float32)
    b1f = jnp.asarray(b1, jnp.float32)
    TU = jnp.dot(jnp.asarray(W, jnp.float32), w1f[:, :K].T) + 0.5 * b1f  # (num_users, K)
    TI = jnp.dot(jnp.asarray(H, jnp.float32), w1f[:, K:].T) + 0.5 * b1f  # (num_items, K)
    tblT = jnp.concatenate([TU, TI], axis=0).T                           # (K, R)
    w2_col = jnp.asarray(w2, jnp.float32).reshape(K, 1)                  # (K, 1)

    # ---- lane-dense index rows ----
    x_idx = jnp.asarray(x_idx, jnp.int32)
    u_row = x_idx[:, 0].reshape(1, B)                                    # (1, B)
    i_row = (x_idx[:, 1] + num_users).reshape(1, B)                      # (1, B)

    # ---- batch tiling (pad ragged batches to whole tiles) ----
    tb = B if B <= block_b else block_b
    pad = (-B) % tb
    if pad:
        # Padding index 0 is always valid; the padded logits are dropped below.
        u_row = jnp.pad(u_row, ((0, 0), (0, pad)))
        i_row = jnp.pad(i_row, ((0, 0), (0, pad)))
    Bp = B + pad
    grid = (pl.cdiv(Bp, tb),)

    out = pl.pallas_call(
        ncf_fused_kernel,
        out_shape=jax.ShapeDtypeStruct((1, Bp), jnp.float32),
        grid=grid,
        in_specs=[
            pl.BlockSpec((1, tb), lambda b: (0, b)),    # user indices (lane-dense)
            pl.BlockSpec((1, tb), lambda b: (0, b)),    # offset item indices
            pl.BlockSpec((K, R), lambda b: (0, 0)),     # folded table (grid-invariant)
            pl.BlockSpec((K, 1), lambda b: (0, 0)),     # linear_2 column (grid-invariant)
        ],
        out_specs=pl.BlockSpec((1, tb), lambda b: (0, b)),  # lane-dense logits row
        compiler_params=pltpu.CompilerParams(
            dimension_semantics=("parallel",),          # shards tiles across TCs (v7x)
        ),
    )(u_row, i_row, tblT, w2_col)

    return out[0, :B].reshape(B, 1)


def ncf_forward_ref(x_idx, W, H, w1, b1, w2):
    """Pure-JAX reference mirroring the PyTorch forward (logits)."""
    U_emb = W[x_idx[:, 0]]
    V_emb = H[x_idx[:, 1]]
    z = jnp.concatenate([U_emb, V_emb], axis=1)
    h1 = jax.nn.relu(z @ w1.T + b1)
    return h1 @ w2.T


if __name__ == "__main__":
    num_users = 16
    num_items = 24
    embedding_k = 4
    batch = 200   # deliberately NOT a multiple of 128 -> exercises ragged-tile padding

    key = jax.random.PRNGKey(0)
    k_w, k_h, k_w1, k_b1, k_w2, k_u, k_i = jax.random.split(key, 7)

    # Deterministic parameter init (shapes per NCF_DR.__init__).
    W = jax.random.normal(k_w, (num_users, embedding_k), jnp.float32)
    H = jax.random.normal(k_h, (num_items, embedding_k), jnp.float32)
    w1 = jax.random.normal(k_w1, (embedding_k, 2 * embedding_k), jnp.float32) * 0.1
    b1 = jax.random.normal(k_b1, (embedding_k,), jnp.float32) * 0.1
    w2 = jax.random.normal(k_w2, (1, embedding_k), jnp.float32) * 0.1

    # Example input: (B, 2) [user_idx, item_idx] pairs.
    user_idx = jax.random.randint(k_u, (batch,), 0, num_users, jnp.int32)
    item_idx = jax.random.randint(k_i, (batch,), 0, num_items, jnp.int32)
    x = jnp.stack([user_idx, item_idx], axis=1)   # (B, 2) int32

    out = jax.block_until_ready(ncf_forward(x, W, H, w1, b1, w2))
    ref = ncf_forward_ref(x, W, H, w1, b1, w2)

    assert out.shape == (batch, 1)
    assert jnp.allclose(out, ref, atol=1e-5, rtol=1e-4), (out, ref)

    print("KERNEL_OK")
</pallas_src>

<mosaic_0001>
module attributes {stable_mosaic.version = 11 : i64} {
  func.func @ncf_fused_kernel(%arg0: i32, %arg1: memref<1x128xi32, #tpu.memory_space<vmem>>, %arg2: memref<1x128xi32, #tpu.memory_space<vmem>>, %arg3: memref<4x40xf32, #tpu.memory_space<vmem>>, %arg4: memref<4x1xf32, #tpu.memory_space<vmem>>, %arg5: memref<1x128xf32, #tpu.memory_space<vmem>>) attributes {dimension_semantics = [#tpu.dimension_semantics<parallel>], iteration_bounds = array<i64: 2>, scalar_prefetch = 0 : i64, scratch_operands = 0 : i64, tpu.core_type = #tpu.core_type<tc>, window_params = [{transform_indices = @transform_0, window_bounds = array<i64: 1, 128>}, {transform_indices = @transform_1, window_bounds = array<i64: 1, 128>}, {pipeline_mode = #tpu.pipeline_mode<synchronous>, transform_indices = @transform_2, window_bounds = array<i64: 4, 40>}, {pipeline_mode = #tpu.pipeline_mode<synchronous>, transform_indices = @transform_3, window_bounds = array<i64: 4, 1>}, {transform_indices = @transform_4, window_bounds = array<i64: 1, 128>}]} {
    %c0 = arith.constant 0 : index
    %c0_0 = arith.constant 0 : index
    %0 = vector.load %arg1[%c0, %c0_0] : memref<1x128xi32, #tpu.memory_space<vmem>>, vector<1x128xi32>
    %c0_1 = arith.constant 0 : index
    %c0_2 = arith.constant 0 : index
    %1 = vector.load %arg2[%c0_1, %c0_2] : memref<1x128xi32, #tpu.memory_space<vmem>>, vector<1x128xi32>
    %2 = tpu.iota {dimensions = array<i32: 0>} : vector<40x128xi32>
    %3 = vector.broadcast %0 : vector<1x128xi32> to vector<40x128xi32>
    %4 = arith.cmpi eq, %2, %3 : vector<40x128xi32>
    %5 = vector.broadcast %1 : vector<1x128xi32> to vector<40x128xi32>
    %6 = arith.cmpi eq, %2, %5 : vector<40x128xi32>
    %7 = arith.ori %4, %6 : vector<40x128xi1>
    %8 = arith.extui %7 : vector<40x128xi1> to vector<40x128xi32>
    %9 = arith.sitofp %8 : vector<40x128xi32> to vector<40x128xf32>
    %c0_3 = arith.constant 0 : index
    %c0_4 = arith.constant 0 : index
    %10 = vector.load %arg3[%c0_3, %c0_4] : memref<4x40xf32, #tpu.memory_space<vmem>>, vector<4x40xf32>
    %cst = arith.constant dense<0.000000e+00> : vector<4x128xf32>
    %11 = tpu.matmul %10, %9, %cst {dimension_numbers = #tpu.dot_dimension_numbers<[1], [0], [0], [1], [0, 0, 1, 1], [], []>} : vector<4x40xf32>, vector<40x128xf32>, vector<4x128xf32> -> vector<4x128xf32>
    %cst_5 = arith.constant 0.000000e+00 : f32
    %12 = vector.broadcast %cst_5 : f32 to vector<4x128xf32>
    %13 = arith.maximumf %11, %12 : vector<4x128xf32>
    %c0_6 = arith.constant 0 : index
    %c0_7 = arith.constant 0 : index
    %14 = vector.load %arg4[%c0_6, %c0_7] : memref<4x1xf32, #tpu.memory_space<vmem>>, vector<4x1xf32>
    %15 = vector.broadcast %14 : vector<4x1xf32> to vector<4x128xf32>
    %16 = arith.mulf %13, %15 : vector<4x128xf32>
    %cst_8 = arith.constant dense<0.000000e+00> : vector<128xf32>
    %17 = vector.multi_reduction <add>, %16, %cst_8 [0] : vector<4x128xf32> to vector<128xf32>
    %18 = vector.shape_cast %17 : vector<128xf32> to vector<1x128xf32>
    %c0_9 = arith.constant 0 : index
    %c0_10 = arith.constant 0 : index
    %19 = vector.load %arg5[%c0_9, %c0_10] : memref<1x128xf32, #tpu.memory_space<vmem>>, vector<1x128xf32>
    tpu.vector_store %arg5[%c0_9, %c0_10], %18 {strides = array<i32>} : memref<1x128xf32, #tpu.memory_space<vmem>>, vector<1x128xf32>,
    return
  }
  func.func @transform_0(%arg0: i32) -> (i32, i32) {
    %c0_i32 = arith.constant 0 : i32
    %c0_i32_0 = arith.constant 0 : i32
    return %c0_i32, %arg0 : i32, i32
  }
  func.func @transform_1(%arg0: i32) -> (i32, i32) {
    %c0_i32 = arith.constant 0 : i32
    %c0_i32_0 = arith.constant 0 : i32
    return %c0_i32, %arg0 : i32, i32
  }
  func.func @transform_2(%arg0: i32) -> (i32, i32) {
    %c0_i32 = arith.constant 0 : i32
    %c0_i32_0 = arith.constant 0 : i32
    %c0_i32_1 = arith.constant 0 : i32
    return %c0_i32, %c0_i32_0 : i32, i32
  }
  func.func @transform_3(%arg0: i32) -> (i32, i32) {
    %c0_i32 = arith.constant 0 : i32
    %c0_i32_0 = arith.constant 0 : i32
    %c0_i32_1 = arith.constant 0 : i32
    return %c0_i32, %c0_i32_0 : i32, i32
  }
  func.func @transform_4(%arg0: i32) -> (i32, i32) {
    %c0_i32 = arith.constant 0 : i32
    %c0_i32_0 = arith.constant 0 : i32
    return %c0_i32, %arg0 : i32, i32
  }
}

</mosaic_0001>

<bundles_post_ra>
// kernel: tpu_custom_call.1
= control target key start
LH: loop header
LB: loop body
LE: loop exit
PB: predicated region body
PF: predicated region fallthrough
CT: control target
= control target key end

     0   :  { %9 = vsyncpa [#allocation3], 0  ;;  %s706_s0 = inlined_call_operand.vmem [shape: s32[1,256], index: 0, kind: input, shape index: {}]   ;;  %s707_s1 = inlined_call_operand.vmem [shape: s32[1,256], index: 1, kind: input, shape index: {}]   ;;  %s708_s2 = inlined_call_operand.vmem [shape: f32[4,40], index: 2, kind: input, shape index: {}]   ;;  %s709_s3 = inlined_call_operand.vmem [shape: f32[4,1], index: 3, kind: input, shape index: {}]   ;;  %s710_s4 = inlined_call_operand.hbm [shape: f32[1,256], index: 4, kind: output, shape index: {}]  }
   0x1   :  { %11 = vsyncpa [#allocation3 + $0x1], 0  ;;  %s597_s15 = smov 0   ;;  %s599_s16 = smov 0  }
   0x2   :  { %s601_s17 = smov 0   ;;  %s603_s18 = smov 0  }
   0x3 LB: > { %s618_s19 = sadd.s32 4294967295, %s563_s18   ;;  %s410_s20 = sadd.s32 4294967294, %s563_s18   ;;  %s563_s18 = sphi %s603_s18, %s716_s18   ;;  %s559_s17 = sphi %s601_s17, %s715_s17   ;;  %s555_s16 = sphi %s599_s16, %s714_s16   ;;  %s551_s15 = sphi %s597_s15, %s713_s15  }
   0x4   : > { %s622_s21 = sadd.s32 1, %s563_s18   ;;  %s118_s22 = sadd.s32 1, %s559_s17 }
   0x5   : > { %s115_s23 = ssub.s32 %s563_s18, %s622_s21  ;;  %p128_p0 = scmp.ne.s32.totalorder %s559_s17, %s555_s16 }
   0x6   : > { %p116_p1 = scmp.eq.s32.totalorder %s115_s23, 0  ;;  %p129_p2 = scmp.eq.s32.totalorder %s618_s19, 1 }
   0x7   : > { %p134_p3 = scmp.ne.s32.totalorder %s555_s16, %s551_s15  ;;  %p135_p4 = scmp.eq.s32.totalorder %s410_s20, 1 }
   0x8   : > { %s633_s24 = scalar_select %p116_p1, %s559_s17, %s118_s22  }
   0x9   : > { %p635_p5 = por %p129_p2, %p128_p0  ;;  %p639_p6 = por %p135_p4, %p134_p3 }
   0xa   : > { %p413_p7 = scmp.ge.s32.totalorder %s563_s18, 1  ;;  %p171_p8 = scmp.lt.s32.totalorder %s563_s18, 3 }
   0xc   : > { %p172_p9 = pnand %p413_p7, %p171_p8 }
   0xd   : > { %p197_p10 = scmp.lt.s32.totalorder (!%p172_p9), %s618_s19, 1  ;;  %v205_v0 = vlaneseq (!%p172_p9)  ;;  %v565_v1 = vmov (!%p172_p9), 0.0|0.0   ;;  %vm566_vm0 = vmmov (!%p172_p9), 0   ;;  %v567_v3 = vmov (!%p172_p9), 0.0   ;;  %v320_v5 = vld [vmem:[%s709_s3] sm:$0xf] (!%p172_p9) }
   0xe   : > { %175 = sbr.rel (%p172_p9) target bundleno = 282 (0x11a), region = 36  ;;  %449 = vmatprep.subr.bf16.mxu0 (!%p172_p9), %v565_v1  ;;  %446 = vmatprep.mubr.msk.f32.mxu0 (!%p172_p9), %vm566_vm0, %v567_v3  ;;  %v568_v4 = vmov (!%p172_p9), 0   ;;  %v569_v12 = vmov (!%p172_p9), 1.0|1.0   ;;  %v244_v13 = vld [vmem:[%s708_s2] sm:$0xf] (!%p172_p9) }
   0xf   : > { %v206_v2 = vshrl.u32 (!%p172_p9), %v205_v0, 7  ;;  %500 = vset.pattern.permute.xlu0 (!%p172_p9), %v568_v4  ;;  %v570_v14 = vmov (!%p172_p9), 1.0   ;;  %s195_s12 = sand.u32 (!%p172_p9), 1, %s555_s16   ;;  %s427_s13 = sshll.u32 (!%p172_p9), %s618_s19, 4 }
  0x10   : > { %323 = vperm.xlu0 (!%p172_p9), %500, %v320_v5   ;;  %s196_s14 = scalar_lea.vmem (!%p172_p9), [#allocation2], %s195_s12  ;;  %s337_s28 = scalar_lea.sflag (!%p172_p9), [#allocation3], %s195_s12 }
  0x11   : > { %v207_v6 = vadd.s32 (!%p172_p9), 8, %v206_v2  ;;  %v208_v7 = vadd.s32 (!%p172_p9), 16, %v206_v2  ;;  %v209_v8 = vadd.s32 (!%p172_p9), 24, %v206_v2  ;;  %v210_v11 = vadd.s32 (!%p172_p9), 32, %v206_v2  ;;  %s349_s20 = sshll.u32 (!%p172_p9), %s196_s14, 4  ;;  %s666_s20 = int_to_ptr.vmem [resolvable:$true] %s349_s20 }
  0x12   : > { %s501_s29 = scalar_lea.vmem (!%p172_p9), %s666_s20, 16 }
  0x13   : > { %p502_p11 = scmp.ne.s32.totalorder (!%p172_p9), %s666_s20, %s501_s29 }
  0x15   : > { %s198_s27 = scalar_select %p197_p10, %s618_s19, 1 }
  0x16   : > { %p503_p12 = pnand %p502_p11, %p635_p5  ;;  %s571_s19 = smov [#allocation2]  }
  0x17   : > { %s199_s6 = scalar_lea.vmem %s706_s0, %s198_s27  ;;  %s202_s9 = scalar_lea.vmem %s707_s1, %s198_s27 }
  0x18   : > { %v414_v9 = vld [vmem:[%s199_s6] ss:$0 sm:$0xff]  ;;  %s664_s27 = scalar_lea.hbm %s710_s4, %s427_s13  ;;  %p504_p13 = pneg %p503_p12 }
  0x19   : > { %v415_v10 = vld [vmem:[%s202_s9] ss:$0 sm:$0xff]  ;;  %vm215_vm1 = vcmp.eq.s32.totalorder %v206_v2, %v414_v9  ;;  %vm216_vm2 = vcmp.eq.s32.totalorder %v207_v6, %v414_v9  ;;  %vm217_vm6 = vcmp.eq.s32.totalorder %v208_v7, %v414_v9  ;;  %vm218_vm9 = vcmp.eq.s32.totalorder %v209_v8, %v414_v9  ;;  %s505_s30 = sshll.u32 %s571_s19, 4  ;;  %s506_s30 = int_to_ptr.vmem [resolvable:$false] %s505_s30 }
  0x1a   : > { %vm224_vm3 = vcmp.eq.s32.totalorder %v206_v2, %v415_v10  ;;  %vm225_vm4 = vcmp.eq.s32.totalorder %v207_v6, %v415_v10  ;;  %vm226_vm7 = vcmp.eq.s32.totalorder %v208_v7, %v415_v10  ;;  %vm227_vm10 = vcmp.eq.s32.totalorder %v209_v8, %v415_v10  ;;  %s507_s5 = scalar_lea.vmem %s506_s30, 32  ;;  %p508_p0 = scmp.lt.s32.totalorder %s666_s20, %s506_s30 }
  0x1b   : > { %vm229_vm5 = vmor %vm215_vm1, %vm224_vm3  ;;  %vm219_vm15 = vcmp.eq.s32.totalorder %v210_v11, %v414_v9  ;;  %vm228_vm0 = vcmp.eq.s32.totalorder %v210_v11, %v415_v10  ;;  %vm327_vm3 = vcmask 1043456   ;;  %p509_p1 = scmp.lt.s32.totalorder %s507_s5, %s501_s29 }
  0x1c   : > { %vm230_vm8 = vmor %vm216_vm2, %vm225_vm4  ;;  %vm245_vm2 = vcmask 326656  }
  0x1d   : > { %vm450_vm11 = vmpackc.low %vm230_vm8, %vm229_vm5  ;;  %p510_p2 = por %p509_p1, %p508_p0 }
  0x1e   : > { %451 = vmatpush3.bf16.msk.msra.mxu0 %vm450_vm11, %v569_v12  ;;  %vm231_vm12 = vmor %vm217_vm6, %vm226_vm7 }
  0x1f   : > { %452 = vmatprep.subr.bf16.mxu0 %v565_v1  ;;  %vm232_vm13 = vmor %vm218_vm9, %vm227_vm10  ;;  %p511_p3 = pnand %p510_p2, %p504_p13 }
  0x20   : > { %vm453_vm14 = vmpackc.low %vm232_vm13, %vm231_vm12 }
  0x21   : > { %vm233_vm1 = vmor %vm219_vm15, %vm228_vm0 }
  0x22   : > { %454 = vmatpush3.bf16.msk.msra.mxu0 %vm453_vm14, %v569_v12 }
  0x23   : > { %444 = vmatprep.subr.mxu0 %v567_v3 }
  0x26   : > { %445 = vmatpush3.msk.msra.mxu0 %vm233_vm1, %v570_v14 }
  0x27   : > { %447 = vmatmul.mubr.msk.f32.vlgmr.msra.gmra.mrb[0].mxu0 %vm245_vm2, %v244_v13 }
  0x8f   : > { %v324_v16 = vpop.permute.xlu0 %323 }
  0xfa   : > { %v315_v15 = vpop.f32.mrb[0].mxu0 }
  0xfb   : > { %v319_v17 = vmax.f32 %v315_v15, 0.0  ;;  %v448_v18 = vpop.f32.mrb[1].mxu0 }
  0xfd   : > { %v326_v19 = vmul.f32 %v324_v16, %v319_v17 }
  0xff   : > { %v328_v20 = vsel %vm327_vm3, %v326_v19, 0.0 }
 0x100   : > { %v329_v21 = vrot.slane %v328_v20, 4 }
 0x102   : > { %v330_v22 = vadd.f32 %v329_v21, %v328_v20 }
 0x104   : > { %v331_v23 = vrot.slane %v330_v22, 2 }
 0x106   : > { %v332_v24 = vadd.f32 %v331_v23, %v330_v22 }
 0x108   : > { %v333_v25 = vrot.slane %v332_v24, 1 }
 0x10a   : > { %v334_v26 = vadd.f32 %v333_v25, %v332_v24 }
 0x10c   : > { %335 = vst [vmem:[%s196_s14] sm:$0x1] %v334_v26 }
 0x10d   : > { %514 = shalt.err (!%p511_p3)
}
 0x10e   : > { %s515_s6 = scalar_lea.hbm %s664_s27, 16  ;;  %s519_s9 = scalar_lea.hbm %s710_s4, 32 }
 0x10f   : > { %p516_p4 = scmp.ne.s32.totalorder %s664_s27, %s515_s6  ;;  %p520_p9 = scmp.lt.u32.totalorder %s664_s27, %s710_s4 }
 0x110   : > { %p521_p10 = scmp.lt.u32.totalorder %s519_s9, %s515_s6  ;;  %p523_p12 = scmp.lt.u32.totalorder %s515_s6, %s664_s27 }
 0x111   : > { %p517_p7 = pnand %p516_p4, %p635_p5 }
 0x112   : > { %p522_p11 = por %p521_p10, %p520_p9 }
 0x113   : > { %p518_p8 = pneg %p517_p7 }
 0x114   : > { %p524_p13 = por %p523_p12, %p522_p11 }
 0x116   : > { %p525_p0 = pnand %p524_p13, %p518_p8 }
 0x118   : > { %528 = shalt.err (!%p525_p0)
}
 0x119   : > { %455 = dma.vmem_to_hbm [thread:$0]  (%p635_p5), %s666_s20, 16, %s664_s27, %s337_s28  }
 0x11a PF: > { %p461_p1 = scmp.ge.s32.totalorder %s563_s18, 2  ;;  %s361_s12 = sand.u32 1, %s551_s15  }
 0x11b   : > { %s362_s13 = scalar_lea.sflag [#allocation3], %s361_s12 }
 0x11c   : > { %p458_p2 = pnand %p461_p1, %p639_p6 }
 0x11e   : > { %546 = dma.done.wait (!%p458_p2), %s362_s13, 16  }
 0x11f   : > { %548 = vsyncadd (!%p458_p2), %s362_s13, 4294967280  ;;  %p14_p3 = scmp.ge.s32.totalorder %s622_s21, 4   ;;  %s713_s15 = smov %s555_s16 }
 0x120   : > { %s714_s16 = smov %s559_s17  ;;  %s715_s17 = smov %s633_s24 }
 0x121   : > { %s716_s18 = smov %s622_s21  ;;  %16 = sbr.rel (!%p14_p3) target bundleno = 3 (0x3), region = 74 }
 0x128   :  { %366 = vsyncpa [#allocation3], 1 }
 0x129   :  { %368 = vsyncpa [#allocation3 + $0x1], 1 }

</bundles_post_ra>
